<compile_context>
chip_gen: v7x
topology: tpu7x:2x2x1
jax: 0.10.0
libtpu: 0.0.40
codegen_flags: <defaults>
</compile_context>

<pallas_src>
import jax
import jax.numpy as jnp
from jax import lax
from jax.experimental import pallas as pl
from jax.experimental.pallas import tpu as pltpu


def hd_inverse_kernel(xT_ref, w1_ref, b1_ref, w2_ref, b2_ref, w3_ref, out_ref):
    """Forward MLP + analytic gradient + symplectic swap.

    Layout: features on sublanes, batch on lanes.
      xT_ref : (D,   TB)   current batch tile, transposed
      w1_ref : (Hid, D)    torch Linear weight (out, in)
      b1_ref : (Hid, 1)
      w2_ref : (Hid, Hid)
      b2_ref : (Hid, 1)
      w3_ref : (Hid, 1)    torch w3 (1, Hid) stored as a column
      out_ref: (D,   TB)
    """
    xT = xT_ref[...].astype(jnp.float32)          # (D, TB)
    w1 = w1_ref[...]
    w2 = w2_ref[...]
    b1 = b1_ref[...]
    b2 = b2_ref[...]
    w3c = w3_ref[...]

    # ---- forward pass of Hnet (up to last hidden activation) ----
    z1 = jnp.dot(w1, xT, preferred_element_type=jnp.float32) + b1   # (Hid, TB)
    h1 = jnp.tanh(z1)
    z2 = jnp.dot(w2, h1, preferred_element_type=jnp.float32) + b2   # (Hid, TB)
    h2 = jnp.tanh(z2)
    # (final Linear(Hid,1) value and b3 do not affect dH/dx)

    # ---- analytic backward pass: dH/dx ----
    g_z2 = w3c * (1.0 - h2 * h2)                                    # (Hid, TB)
    # g_h1 = W2^T @ g_z2  (contract dim 0 of W2 -> no extra weight copy needed)
    g_h1 = lax.dot_general(w2, g_z2, (((0,), (0,)), ((), ())),
                           preferred_element_type=jnp.float32)      # (Hid, TB)
    g_z1 = g_h1 * (1.0 - h1 * h1)                                   # (Hid, TB)
    # g_x = W1^T @ g_z1
    g_x = lax.dot_general(w1, g_z1, (((0,), (0,)), ((), ())),
                          preferred_element_type=jnp.float32)       # (D, TB)

    # ---- symplectic swap: rows become [ -dp | dq ] ----
    d = g_x.shape[0] // 2
    rolled = pltpu.roll(g_x, shift=d, axis=0)       # rows [dp | dq]  (XLU)
    sign = jnp.where(
        lax.broadcasted_iota(jnp.int32, g_x.shape, 0) < d, -1.0, 1.0)
    out_ref[...] = (rolled * sign).astype(out_ref.dtype)            # one store


def hd_inverse_net(t, x, params, *, batch_tile=None):
    """Pallas wrapper. `t` is ignored (as in the PyTorch module).

    x: (B, D) with features = [q | p]. Returns (B, D) = cat(-dp, dq).
    """
    del t
    w1, b1, w2, b2, w3, b3 = params   # torch Linear shapes: (out, in) / (out,)
    del b3                            # does not influence the gradient
    B, D = x.shape
    Hid = w1.shape[0]

    # Batch tile: full batch if small, else a lane-dense multiple of 128.
    if batch_tile is None:
        batch_tile = B if B <= 1024 else 1024
    TB = batch_tile
    grid = (pl.cdiv(B, TB),)

    # Glue: batch onto the 128-lane axis; biases / w3 as columns.
    xT = x.T                          # (D, B)
    b1c = b1.reshape(Hid, 1)
    b2c = b2.reshape(Hid, 1)
    w3c = w3.reshape(Hid, 1)

    def resident(shape):
        # Weights/biases: same block every grid step -> stay VMEM-resident.
        return pl.BlockSpec(shape, lambda i: (0, 0))

    outT = pl.pallas_call(
        hd_inverse_kernel,
        out_shape=jax.ShapeDtypeStruct((D, B), x.dtype),
        grid=grid,
        in_specs=[
            pl.BlockSpec((D, TB), lambda i: (0, i)),   # x tile (batch on lanes)
            resident((Hid, D)),                        # w1
            resident((Hid, 1)),                        # b1
            resident((Hid, Hid)),                      # w2
            resident((Hid, 1)),                        # b2
            resident((Hid, 1)),                        # w3 (as column)
        ],
        out_specs=pl.BlockSpec((D, TB), lambda i: (0, i)),
        compiler_params=pltpu.CompilerParams(
            dimension_semantics=("parallel",),         # v7x: shard over 2 TCs
            vmem_limit_bytes=32 * 1024 * 1024,
        ),
    )(xT, w1, b1c, w2, b2c, w3c)
    return outT.T


# ---------------- pure-JAX reference (autograd, mirrors torch) ----------------
def _hnet_ref(qp, params):
    w1, b1, w2, b2, w3, b3 = params
    h1 = jnp.tanh(qp @ w1.T + b1)
    h2 = jnp.tanh(h1 @ w2.T + b2)
    return h2 @ w3.T + b3


def hd_inverse_ref(t, x, params):
    del t
    dH = jax.grad(lambda qp: _hnet_ref(qp, params).sum())(x)
    d = x.shape[1] // 2
    dq, dp = dH[:, :d], dH[:, d:]
    return jnp.concatenate([-dp, dq], axis=1)


if __name__ == "__main__":
    D, HID = 16, 32                   # state dim (q,p each 8), hidden width
    key = jax.random.PRNGKey(0)
    kx, k1, k2, k3, kb1, kb2, kx2 = jax.random.split(key, 7)

    # Deterministic Hnet parameters (torch nn.Linear weight shapes: (out, in)).
    scale = 0.1
    params = (
        scale * jax.random.normal(k1, (HID, D), dtype=jnp.float32),    # w1
        scale * jax.random.normal(kb1, (HID,), dtype=jnp.float32),     # b1
        scale * jax.random.normal(k2, (HID, HID), dtype=jnp.float32),  # w2
        scale * jax.random.normal(kb2, (HID,), dtype=jnp.float32),     # b2
        scale * jax.random.normal(k3, (1, HID), dtype=jnp.float32),    # w3
        jnp.zeros((1,), dtype=jnp.float32),                            # b3
    )
    t = jnp.float32(0.0)

    # --- small test: batch=8, single grid step, full-batch tile ---
    B = 8
    x = jax.random.normal(kx, (B, D), dtype=jnp.float32)
    out = jax.block_until_ready(hd_inverse_net(t, x, params))
    ref = hd_inverse_ref(t, x, params)
    assert out.shape == (B, D)
    assert jnp.allclose(out, ref, atol=1e-5, rtol=1e-5), (
        f"max abs err {jnp.max(jnp.abs(out - ref))}")

    # --- tiled test: batch=2048, TB=1024 -> grid=(2,) pipelined over batch ---
    B2 = 2048
    x2 = jax.random.normal(kx2, (B2, D), dtype=jnp.float32)
    out2 = jax.block_until_ready(hd_inverse_net(t, x2, params, batch_tile=1024))
    ref2 = hd_inverse_ref(t, x2, params)
    assert out2.shape == (B2, D)
    assert jnp.allclose(out2, ref2, atol=1e-5, rtol=1e-5), (
        f"max abs err {jnp.max(jnp.abs(out2 - ref2))}")

    print("KERNEL_OK")
</pallas_src>

<mosaic_0001>
module attributes {stable_mosaic.version = 11 : i64} {
  func.func @hd_inverse_kernel(%arg0: i32, %arg1: memref<16x8xf32, #tpu.memory_space<vmem>>, %arg2: memref<32x16xf32, #tpu.memory_space<vmem>>, %arg3: memref<32x1xf32, #tpu.memory_space<vmem>>, %arg4: memref<32x32xf32, #tpu.memory_space<vmem>>, %arg5: memref<32x1xf32, #tpu.memory_space<vmem>>, %arg6: memref<32x1xf32, #tpu.memory_space<vmem>>, %arg7: memref<16x8xf32, #tpu.memory_space<vmem>>) attributes {dimension_semantics = [#tpu.dimension_semantics<parallel>], iteration_bounds = array<i64: 1>, scalar_prefetch = 0 : i64, scratch_operands = 0 : i64, tpu.core_type = #tpu.core_type<tc>, window_params = [{transform_indices = @transform_0, window_bounds = array<i64: 16, 8>}, {pipeline_mode = #tpu.pipeline_mode<synchronous>, transform_indices = @transform_1, window_bounds = array<i64: 32, 16>}, {pipeline_mode = #tpu.pipeline_mode<synchronous>, transform_indices = @transform_2, window_bounds = array<i64: 32, 1>}, {pipeline_mode = #tpu.pipeline_mode<synchronous>, transform_indices = @transform_3, window_bounds = array<i64: 32, 32>}, {pipeline_mode = #tpu.pipeline_mode<synchronous>, transform_indices = @transform_4, window_bounds = array<i64: 32, 1>}, {pipeline_mode = #tpu.pipeline_mode<synchronous>, transform_indices = @transform_5, window_bounds = array<i64: 32, 1>}, {transform_indices = @transform_6, window_bounds = array<i64: 16, 8>}]} {
    %c0 = arith.constant 0 : index
    %c0_0 = arith.constant 0 : index
    %0 = vector.load %arg1[%c0, %c0_0] : memref<16x8xf32, #tpu.memory_space<vmem>>, vector<16x8xf32>
    %c0_1 = arith.constant 0 : index
    %c0_2 = arith.constant 0 : index
    %1 = vector.load %arg2[%c0_1, %c0_2] : memref<32x16xf32, #tpu.memory_space<vmem>>, vector<32x16xf32>
    %c0_3 = arith.constant 0 : index
    %c0_4 = arith.constant 0 : index
    %2 = vector.load %arg4[%c0_3, %c0_4] : memref<32x32xf32, #tpu.memory_space<vmem>>, vector<32x32xf32>
    %c0_5 = arith.constant 0 : index
    %c0_6 = arith.constant 0 : index
    %3 = vector.load %arg3[%c0_5, %c0_6] : memref<32x1xf32, #tpu.memory_space<vmem>>, vector<32x1xf32>
    %c0_7 = arith.constant 0 : index
    %c0_8 = arith.constant 0 : index
    %4 = vector.load %arg5[%c0_7, %c0_8] : memref<32x1xf32, #tpu.memory_space<vmem>>, vector<32x1xf32>
    %c0_9 = arith.constant 0 : index
    %c0_10 = arith.constant 0 : index
    %5 = vector.load %arg6[%c0_9, %c0_10] : memref<32x1xf32, #tpu.memory_space<vmem>>, vector<32x1xf32>
    %cst = arith.constant dense<0.000000e+00> : vector<32x8xf32>
    %6 = tpu.matmul %1, %0, %cst {dimension_numbers = #tpu.dot_dimension_numbers<[1], [0], [0], [1], [0, 0, 1, 1], [], []>} : vector<32x16xf32>, vector<16x8xf32>, vector<32x8xf32> -> vector<32x8xf32>
    %7 = vector.broadcast %3 : vector<32x1xf32> to vector<32x8xf32>
    %8 = arith.addf %6, %7 : vector<32x8xf32>
    %9 = math.tanh %8 : vector<32x8xf32>
    %cst_11 = arith.constant dense<0.000000e+00> : vector<32x8xf32>
    %10 = tpu.matmul %2, %9, %cst_11 {dimension_numbers = #tpu.dot_dimension_numbers<[1], [0], [0], [1], [0, 0, 1, 1], [], []>} : vector<32x32xf32>, vector<32x8xf32>, vector<32x8xf32> -> vector<32x8xf32>
    %11 = vector.broadcast %4 : vector<32x1xf32> to vector<32x8xf32>
    %12 = arith.addf %10, %11 : vector<32x8xf32>
    %13 = math.tanh %12 : vector<32x8xf32>
    %14 = arith.mulf %13, %13 : vector<32x8xf32>
    %cst_12 = arith.constant 1.000000e+00 : f32
    %15 = vector.broadcast %cst_12 : f32 to vector<32x8xf32>
    %16 = arith.subf %15, %14 : vector<32x8xf32>
    %17 = vector.broadcast %5 : vector<32x1xf32> to vector<32x8xf32>
    %18 = arith.mulf %17, %16 : vector<32x8xf32>
    %cst_13 = arith.constant dense<0.000000e+00> : vector<32x8xf32>
    %19 = tpu.matmul %2, %18, %cst_13 {dimension_numbers = #tpu.dot_dimension_numbers<[0], [0], [1], [1], [0, 1, 1, 1], [], []>} : vector<32x32xf32>, vector<32x8xf32>, vector<32x8xf32> -> vector<32x8xf32>
    %20 = arith.mulf %9, %9 : vector<32x8xf32>
    %cst_14 = arith.constant 1.000000e+00 : f32
    %21 = vector.broadcast %cst_14 : f32 to vector<32x8xf32>
    %22 = arith.subf %21, %20 : vector<32x8xf32>
    %23 = arith.mulf %19, %22 : vector<32x8xf32>
    %cst_15 = arith.constant dense<0.000000e+00> : vector<16x8xf32>
    %24 = tpu.matmul %1, %23, %cst_15 {dimension_numbers = #tpu.dot_dimension_numbers<[0], [0], [1], [1], [0, 1, 1, 1], [], []>} : vector<32x16xf32>, vector<32x8xf32>, vector<16x8xf32> -> vector<16x8xf32>
    %c8_i32 = arith.constant 8 : i32
    %25 = tpu.dynamic_rotate %24 by %c8_i32 dim 0 : vector<16x8xf32>, i32 -> vector<16x8xf32>
    %26 = tpu.iota {dimensions = array<i32: 0>} : vector<16x8xi32>
    %c8_i32_16 = arith.constant 8 : i32
    %27 = vector.broadcast %c8_i32_16 : i32 to vector<16x8xi32>
    %28 = arith.cmpi slt, %26, %27 : vector<16x8xi32>
    %cst_17 = arith.constant -1.000000e+00 : f32
    %cst_18 = arith.constant 1.000000e+00 : f32
    %29 = vector.broadcast %cst_17 : f32 to vector<16x8xf32>
    %30 = vector.broadcast %cst_18 : f32 to vector<16x8xf32>
    %31 = arith.select %28, %29, %30 : vector<16x8xi1>, vector<16x8xf32>
    %32 = arith.mulf %25, %31 : vector<16x8xf32>
    %c0_19 = arith.constant 0 : index
    %c0_20 = arith.constant 0 : index
    %33 = vector.load %arg7[%c0_19, %c0_20] : memref<16x8xf32, #tpu.memory_space<vmem>>, vector<16x8xf32>
    tpu.vector_store %arg7[%c0_19, %c0_20], %32 {strides = array<i32>} : memref<16x8xf32, #tpu.memory_space<vmem>>, vector<16x8xf32>,
    return
  }
  func.func @transform_0(%arg0: i32) -> (i32, i32) {
    %c0_i32 = arith.constant 0 : i32
    %c0_i32_0 = arith.constant 0 : i32
    return %c0_i32, %arg0 : i32, i32
  }
  func.func @transform_1(%arg0: i32) -> (i32, i32) {
    %c0_i32 = arith.constant 0 : i32
    %c0_i32_0 = arith.constant 0 : i32
    %c0_i32_1 = arith.constant 0 : i32
    return %c0_i32, %c0_i32_0 : i32, i32
  }
  func.func @transform_2(%arg0: i32) -> (i32, i32) {
    %c0_i32 = arith.constant 0 : i32
    %c0_i32_0 = arith.constant 0 : i32
    %c0_i32_1 = arith.constant 0 : i32
    return %c0_i32, %c0_i32_0 : i32, i32
  }
  func.func @transform_3(%arg0: i32) -> (i32, i32) {
    %c0_i32 = arith.constant 0 : i32
    %c0_i32_0 = arith.constant 0 : i32
    %c0_i32_1 = arith.constant 0 : i32
    return %c0_i32, %c0_i32_0 : i32, i32
  }
  func.func @transform_4(%arg0: i32) -> (i32, i32) {
    %c0_i32 = arith.constant 0 : i32
    %c0_i32_0 = arith.constant 0 : i32
    %c0_i32_1 = arith.constant 0 : i32
    return %c0_i32, %c0_i32_0 : i32, i32
  }
  func.func @transform_5(%arg0: i32) -> (i32, i32) {
    %c0_i32 = arith.constant 0 : i32
    %c0_i32_0 = arith.constant 0 : i32
    %c0_i32_1 = arith.constant 0 : i32
    return %c0_i32, %c0_i32_0 : i32, i32
  }
  func.func @transform_6(%arg0: i32) -> (i32, i32) {
    %c0_i32 = arith.constant 0 : i32
    %c0_i32_0 = arith.constant 0 : i32
    return %c0_i32, %arg0 : i32, i32
  }
}

</mosaic_0001>

<bundles_post_ra>
// kernel: tpu_custom_call.1
= control target key start
LH: loop header
LB: loop body
LE: loop exit
PB: predicated region body
PF: predicated region fallthrough
CT: control target
= control target key end

     0   :  { %vm65_vm0 = vcmask 130048   ;;  %v730_v3 = vmov 0   ;;  %vm187_vm1 = vcmask 261120   ;;  %vm584_vm2 = vcmask 64512   ;;  %s872_s0 = inlined_call_operand.vmem [shape: f32[16,8], index: 0, kind: input, shape index: {}]   ;;  %s873_s1 = inlined_call_operand.vmem [shape: f32[32,16], index: 1, kind: input, shape index: {}]   ;;  %s874_s2 = inlined_call_operand.vmem [shape: f32[32,1], index: 2, kind: input, shape index: {}]   ;;  %s875_s4 = inlined_call_operand.vmem [shape: f32[32,1], index: 4, kind: input, shape index: {}]   ;;  %s876_s5 = inlined_call_operand.vmem [shape: f32[32,1], index: 5, kind: input, shape index: {}]   ;;  %s877_s3 = inlined_call_operand.vmem [shape: f32[32,32], index: 3, kind: input, shape index: {}]   ;;  %s878_s6 = inlined_call_operand.vmem [shape: f32[16,8], index: 6, kind: output, shape index: {}]  }
   0x1   :  { %v23_v0 = vld [vmem:[%s872_s0] sm:$0xff]  ;;  %v24_v1 = vld [vmem:[%s872_s0 + $0x8] sm:$0xff]  ;;  %712 = vset.pattern.permute.xlu0 %v730_v3  ;;  %713 = vset.pattern.permute.xlu1 %v730_v3  ;;  %v35_v6 = vld [vmem:[%s874_s2 + $0x10] sm:$0xff] }
   0x2   :  { %v25_v2 = vld [vmem:[%s873_s1] sm:$0xff]  ;;  %v682_v4 = vpack.c.bf16 %v24_v1, %v23_v0  ;;  %v26_v7 = vld [vmem:[%s873_s1 + $0x8] sm:$0xff]  ;;  %57 = vperm.xlu1 %713, %v35_v6   ;;  %v27_v9 = vld [vmem:[%s873_s1 + $0x10] sm:$0xff] }
   0x3   :  { %637 = vmatprep.mubr.msk.f32.mxu0 %vm65_vm0, %v25_v2  ;;  %v33_v5 = vld [vmem:[%s874_s2] sm:$0xff]  ;;  %v34_v8 = vld [vmem:[%s874_s2 + $0x8] sm:$0xff]  ;;  %v36_v10 = vld [vmem:[%s874_s2 + $0x18] sm:$0xff] }
   0x4   :  { %683 = vmatprep.subr.bf16.mxu0 %v682_v4  ;;  %47 = vperm.xlu0 %712, %v33_v5   ;;  %v28_v11 = vld [vmem:[%s873_s1 + $0x18] sm:$0xff]  ;;  %v37_v12 = vld [vmem:[%s875_s4] sm:$0xff]  ;;  %v38_v13 = vld [vmem:[%s875_s4 + $0x8] sm:$0xff] }
   0x5   :  { %685 = vmatpush3.bf16.msra.mxu0 %v682_v4  ;;  %v39_v14 = vld [vmem:[%s875_s4 + $0x10] sm:$0xff]  ;;  %v40_v15 = vld [vmem:[%s875_s4 + $0x18] sm:$0xff]  ;;  %v41_v16 = vld [vmem:[%s876_s5] sm:$0xff] }
   0x6   :  { %62 = vperm.xlu1 %713, %v36_v10   ;;  %v42_v17 = vld [vmem:[%s876_s5 + $0x8] sm:$0xff]  ;;  %v43_v18 = vld [vmem:[%s876_s5 + $0x10] sm:$0xff]  ;;  %v44_v19 = vld [vmem:[%s876_s5 + $0x18] sm:$0xff] }
   0x7   :  { %v29_v20 = vld [vmem:[%s877_s3] sm:$0xff]  ;;  %v30_v21 = vld [vmem:[%s877_s3 + $0x8] sm:$0xff]  ;;  %v31_v22 = vld [vmem:[%s877_s3 + $0x10] sm:$0xff] }
   0x8   :  { %638 = vmatmul.mubr.msk.f32.vlgmr.msra.gmra.mrb[0].mxu0 %vm65_vm0, %v26_v7  ;;  %52 = vperm.xlu0 %712, %v34_v8   ;;  %v32_v23 = vld [vmem:[%s877_s3 + $0x18] sm:$0xff] }
   0x9   :  { %640 = vmatprep.mubr.msk.f32.mxu0 %vm65_vm0, %v27_v9  ;;  %651 = vmatprep.mubr.msk.f32.mxu1 %vm187_vm1, %v29_v20 }
   0xa   :  { %174 = vperm.xlu1 %713, %v38_v13  }
   0xc   :  { %641 = vmatmul.mubr.msk.f32.gmra.mrb[2].mxu0 %vm65_vm0, %v28_v11  ;;  %169 = vperm.xlu0 %712, %v37_v12  }
   0xe   :  { %184 = vperm.xlu1 %713, %v40_v15  }
  0x10   :  { %179 = vperm.xlu0 %712, %v39_v14  }
  0x12   :  { %304 = vperm.xlu1 %713, %v42_v17  }
  0x14   :  { %299 = vperm.xlu0 %712, %v41_v16  }
  0x16   :  { %314 = vperm.xlu1 %713, %v44_v19  }
  0x18   :  { %309 = vperm.xlu0 %712, %v43_v18  }
  0x36   :  { %321 = vxpose.xlu0.b32.start [1/4] (short) (narrow) %v29_v20, 32 }
  0x3a   :  { %322 = vxpose.xlu0.b32.cont [2/4] (short) (narrow) %v30_v21, 32 }
  0x3e   :  { %323 = vxpose.xlu0.b32.cont [3/4] (short) (narrow) %v31_v22, 32 }
  0x3f   :  { %462 = vxpose.xlu1.b32.start [1/4] (short) (narrow) %v25_v2, 16 }
  0x42   :  { %324 = vxpose.xlu0.b32.end [4/4] (short) (narrow) %v32_v23, 32 }
  0x43   :  { %463 = vxpose.xlu1.b32.cont [2/4] (short) (narrow) %v26_v7, 16 }
  0x47   :  { %464 = vxpose.xlu1.b32.cont [3/4] (short) (narrow) %v27_v9, 16 }
  0x4b   :  { %465 = vxpose.xlu1.b32.end [4/4] (short) (narrow) %v28_v11, 16 }
  0x81   :  { %v58_v25 = vpop.permute.xlu1 %57 }
  0x83   :  { %v48_v24 = vpop.permute.xlu0 %47 }
  0x85   :  { %v63_v31 = vpop.permute.xlu1 %62 }
  0x87   :  { %v53_v26 = vpop.permute.xlu0 %52 }
  0x89   :  { %v175_v47 = vpop.permute.xlu1 %174 }
  0x8b   :  { %v170_v42 = vpop.permute.xlu0 %169 }
  0x8d   :  { %v185_v52 = vpop.permute.xlu1 %184 }
  0x8f   :  { %v180_v43 = vpop.permute.xlu0 %179 }
  0x91   :  { %v305_v60 = vpop.permute.xlu1 %304 }
  0x93   :  { %v300_v44 = vpop.permute.xlu0 %299 }
  0x95   :  { %v315_v8 = vpop.permute.xlu1 %314 }
  0x97   :  { %v310_v45 = vpop.permute.xlu0 %309 }
  0xb6   :  { %v337_v46 = vpop.trf.xlu0 }
  0xb7   :  { %665 = vmatprep.mubr.msk.f32.mxu0 %vm187_vm1, %v337_v46 }
  0xba   :  { %v338_v7 = vpop.trf.xlu0 }
  0xbe   :  { %v339_v14 = vpop.trf.xlu0 }
  0xbf   :  { %v478_v16 = vpop.trf.xlu1 }
  0xc2   :  { %v340_v15 = vpop.trf.xlu0 }
  0xdb   :  { %v639_v27 = vpop.f32.mrb[0].mxu0 }
  0xdc   :  { %v150_v28 = vadd.f32 %v639_v27, %v53_v26  ;;  %v144_v29 = vpop.f32.mrb[1].mxu0 }
  0xdd   :  { %v145_v30 = vadd.f32 %v144_v29, %v48_v24 }
  0xde   :  { %714 = vtanh.f32 %v150_v28 }
  0xdf   :  { %716 = vtanh.f32 %v145_v30  ;;  %v642_v32 = vpop.f32.mrb[2].mxu0 }
  0xe0   :  { %v160_v33 = vadd.f32 %v642_v32, %v63_v31  ;;  %v154_v34 = vpop.f32.mrb[3].mxu0 }
  0xe1   :  { %v155_v35 = vadd.f32 %v154_v34, %v58_v25 }
  0xe2   :  { %718 = vtanh.f32 %v160_v33 }
  0xe3   :  { %720 = vtanh.f32 %v155_v35  ;;  %v479_v35 = vpop.trf.xlu1 }
  0xe8   :  { %v837_v36 = vpop.eup %714 }
  0xe9   :  { %v839_v37 = vpop.eup %716  ;;  %v451_v17 = vmul.f32 %v837_v36, %v837_v36 }
  0xea   :  { %v686_v38 = vpack.c.bf16 %v837_v36, %v839_v37  ;;  %v450_v18 = vmul.f32 %v839_v37, %v839_v37 }
  0xeb   :  { %v455_v19 = vsub.f32 1.0, %v451_v17 }
  0xec   :  { %v843_v39 = vpop.eup %718  ;;  %687 = vmatprep.subr.bf16.mxu1 %v686_v38 }
  0xed   :  { %v845_v40 = vpop.eup %720  ;;  %689 = vmatpush3.bf16.msra.mxu1 %v686_v38  ;;  %v453_v20 = vmul.f32 %v843_v39, %v843_v39 }
  0xee   :  { %v690_v41 = vpack.c.bf16 %v843_v39, %v845_v40 }
  0xef   :  { %v457_v27 = vsub.f32 1.0, %v453_v20 }
  0xf0   :  { %691 = vmatprep.subr.bf16.mxu1 %v690_v41 }
  0xf1   :  { %693 = vmatpush3.bf16.msra.mxu1 %v690_v41 }
  0xf4   :  { %652 = vmatmul.mubr.msk.f32.vlgmr.msra.gmra.mrb[0].mxu1 %vm187_vm1, %v30_v21 }
  0xf5   :  { %654 = vmatprep.mubr.msk.f32.mxu1 %vm187_vm1, %v31_v22  ;;  %v454_v22 = vsub.f32 1.0, %v450_v18 }
  0xf8   :  { %655 = vmatmul.mubr.msk.f32.gmra.mrb[2].mxu1 %vm187_vm1, %v32_v23  ;;  %v452_v23 = vmul.f32 %v845_v40, %v845_v40 }
  0xf9   :  { %679 = vmatprep.mubr.msk.f32.mxu1 %vm187_vm1, %v478_v16 }
  0xfa   :  { %v456_v30 = vsub.f32 1.0, %v452_v23 }
 0x1c7   :  { %v653_v48 = vpop.f32.mrb[0].mxu1 }
 0x1c8   :  { %v272_v49 = vadd.f32 %v653_v48, %v175_v47  ;;  %v266_v50 = vpop.f32.mrb[1].mxu1 }
 0x1c9   :  { %v267_v51 = vadd.f32 %v266_v50, %v170_v42 }
 0x1ca   :  { %722 = vtanh.f32 %v272_v49 }
 0x1cb   :  { %724 = vtanh.f32 %v267_v51  ;;  %v656_v53 = vpop.f32.mrb[2].mxu1 }
 0x1cc   :  { %v282_v54 = vadd.f32 %v656_v53, %v185_v52  ;;  %v276_v55 = vpop.f32.mrb[3].mxu1 }
 0x1cd   :  { %v277_v56 = vadd.f32 %v276_v55, %v180_v43 }
 0x1ce   :  { %726 = vtanh.f32 %v282_v54 }
 0x1cf   :  { %728 = vtanh.f32 %v277_v56 }
 0x1d4   :  { %v723_v57 = vpop.eup %722 }
 0x1d5   :  { %v725_v58 = vpop.eup %724  ;;  %v290_v59 = vmul.f32 %v723_v57, %v723_v57 }
 0x1d6   :  { %v289_v61 = vmul.f32 %v725_v58, %v725_v58 }
 0x1d7   :  { %v294_v62 = vsub.f32 1.0, %v290_v59 }
 0x1d8   :  { %v727_v63 = vpop.eup %726  ;;  %v293_v0 = vsub.f32 1.0, %v289_v61 }
 0x1d9   :  { %v729_v1 = vpop.eup %728  ;;  %v292_v2 = vmul.f32 %v727_v63, %v727_v63  ;;  %v318_v3 = vmul.f32 %v305_v60, %v294_v62 }
 0x1da   :  { %v291_v4 = vmul.f32 %v729_v1, %v729_v1  ;;  %v317_v5 = vmul.f32 %v300_v44, %v293_v0 }
 0x1db   :  { %v296_v6 = vsub.f32 1.0, %v292_v2 }
 0x1dc   :  { %v295_v9 = vsub.f32 1.0, %v291_v4  ;;  %v694_v10 = vpack.c.bf16 %v318_v3, %v317_v5 }
 0x1dd   :  { %v320_v11 = vmul.f32 %v315_v8, %v296_v6 }
 0x1de   :  { %695 = vmatprep.subr.bf16.mxu0 %v694_v10  ;;  %v319_v12 = vmul.f32 %v310_v45, %v295_v9 }
 0x1df   :  { %697 = vmatpush3.bf16.msra.mxu0 %v694_v10 }
 0x1e0   :  { %v698_v13 = vpack.c.bf16 %v320_v11, %v319_v12 }
 0x1e2   :  { %699 = vmatprep.subr.bf16.mxu0 %v698_v13 }
 0x1e3   :  { %701 = vmatpush3.bf16.msra.mxu0 %v698_v13 }
 0x1e6   :  { %666 = vmatmul.mubr.msk.f32.vlgmr.msra.gmra.mrb[4].mxu0 %vm187_vm1, %v338_v7 }
 0x1e7   :  { %668 = vmatprep.mubr.msk.f32.mxu0 %vm187_vm1, %v339_v14 }
 0x1ea   :  { %669 = vmatmul.mubr.msk.f32.gmra.mrb[6].mxu0 %vm187_vm1, %v340_v15 }
 0x2b9   :  { %v667_v21 = vpop.f32.mrb[4].mxu0 }
 0x2ba   :  { %v459_v24 = vmul.f32 %v667_v21, %v455_v19  ;;  %v431_v25 = vpop.f32.mrb[5].mxu0 }
 0x2bb   :  { %v458_v26 = vmul.f32 %v454_v22, %v431_v25 }
 0x2bd   :  { %v702_v28 = vpack.c.bf16 %v459_v24, %v458_v26  ;;  %v670_v29 = vpop.f32.mrb[6].mxu0 }
 0x2be   :  { %v461_v31 = vmul.f32 %v670_v29, %v457_v27  ;;  %v441_v32 = vpop.f32.mrb[7].mxu0 }
 0x2bf   :  { %v460_v33 = vmul.f32 %v456_v30, %v441_v32  ;;  %703 = vmatprep.subr.bf16.mxu1 %v702_v28 }
 0x2c0   :  { %705 = vmatpush3.bf16.msra.mxu1 %v702_v28 }
 0x2c1   :  { %v706_v34 = vpack.c.bf16 %v461_v31, %v460_v33 }
 0x2c3   :  { %707 = vmatprep.subr.bf16.mxu1 %v706_v34 }
 0x2c4   :  { %709 = vmatpush3.bf16.msra.mxu1 %v706_v34 }
 0x2c7   :  { %680 = vmatmul.mubr.msk.f32.vlgmr.msra.gmra.mrb[4].mxu1 %vm187_vm1, %v479_v35 }
 0x39a   :  { %v681_v36 = vpop.f32.mrb[4].mxu1 }
 0x39b   :  { %v582_v37 = vmul.f32 -1.0, %v681_v36  ;;  %v566_v38 = vpop.f32.mrb[5].mxu1 }
 0x39c   :  { %586 = vst.msk [vmem:[%s878_s6 + $0x8] sm:$0xff] %vm584_vm2, %v566_v38 }
 0x39d   :  { %585 = vst.msk [vmem:[%s878_s6] sm:$0xff] %vm584_vm2, %v582_v37 }

</bundles_post_ra>
